<compile_context>
chip_gen: v7x
topology: tpu7x:2x2x1
jax: 0.10.0
libtpu: 0.0.40
codegen_flags: <defaults>
</compile_context>

<pallas_src>
import functools

import jax
import jax.numpy as jnp
from jax.experimental import pallas as pl
from jax.experimental.pallas import tpu as pltpu

_LANES = 128
_SUBLANES = 8
_TARGET_ROWS = 8192                  # 8192 x 128 x 4 B = 4 MiB f32 per block
_RESIDENT_MAX_ELEMS = 512 * 1024     # <= 2 MiB f32: whole-tensor-in-VMEM path
_VMEM_LIMIT = 48 * 1024 * 1024       # < v7x 64 MiB physical, >> actual usage


def _round_up(x, m):
    return ((x + m - 1) // m) * m


# ----------------------------- kernels --------------------------------------


def _resident_kernel(x_ref, o_ref):
    """Small inputs: whole tensor in VMEM, one read + one write of HBM."""
    x = x_ref[...].astype(jnp.float32)
    m = jnp.max(x)
    p = jnp.exp(x - m)
    s = jnp.sum(p)
    o_ref[...] = (p * (1.0 / s)).astype(o_ref.dtype)


def _partials_kernel(x_ref, m_ref, s_ref, *, bm, rows, ragged):
    """Phase 0: per-block (8,128) max / rescaled exp-sum partials (VALU only)."""
    x = x_ref[...].astype(jnp.float32)                       # (bm, 128)
    x3 = x.reshape(bm // _SUBLANES, _SUBLANES, _LANES)        # layout-preserving
    if ragged:
        # Mask garbage rows of the boundary-padded last block with -inf.
        t = pl.program_id(0)
        i0 = jax.lax.broadcasted_iota(jnp.int32, x3.shape, 0)
        i1 = jax.lax.broadcasted_iota(jnp.int32, x3.shape, 1)
        row = t * bm + i0 * _SUBLANES + i1
        x3 = jnp.where(row < rows, x3, -jnp.inf)
    m_tile = jnp.max(x3, axis=0)                             # (8,128), VALU
    # Guard fully -inf positions (masked tail): avoids exp(-inf - (-inf)) = NaN.
    m_safe = jnp.maximum(m_tile, jnp.finfo(jnp.float32).min)
    p = jnp.exp(x3 - m_safe[None])                           # EUP, n exps
    s_tile = jnp.sum(p, axis=0)                              # (8,128), VALU
    m_ref[...] = m_tile[None]
    s_ref[...] = s_tile[None]


def _normalize_kernel(z_ref, x_ref, o_ref):
    """Phase 1: y = exp(x - z), z = m + log(s) folded into a single scalar."""
    x = x_ref[...].astype(jnp.float32)
    o_ref[...] = jnp.exp(x - z_ref[...]).astype(o_ref.dtype)


# ----------------------------- wrappers --------------------------------------


def _softmax_resident(flat, n, orig_shape, orig_dtype):
    rows = pl.cdiv(n, _LANES)
    rows8 = _round_up(rows, _SUBLANES)
    n_pad = rows8 * _LANES
    if n_pad != n:                       # tiny input: cheap -inf pad is fine
        flat = jnp.pad(flat, (0, n_pad - n), constant_values=-jnp.inf)
    x2d = flat.reshape(rows8, _LANES)
    itemsize = jnp.dtype(orig_dtype).itemsize

    out = pl.pallas_call(
        _resident_kernel,
        out_shape=jax.ShapeDtypeStruct((rows8, _LANES), orig_dtype),
        grid=(1,),
        in_specs=[pl.BlockSpec((rows8, _LANES), lambda i: (0, 0))],
        out_specs=pl.BlockSpec((rows8, _LANES), lambda i: (0, 0)),
        compiler_params=pltpu.CompilerParams(
            dimension_semantics=("arbitrary",),
            vmem_limit_bytes=_VMEM_LIMIT),
        cost_estimate=pl.CostEstimate(
            flops=4 * n_pad, transcendentals=n_pad,
            bytes_accessed=2 * n_pad * itemsize),
    )(x2d)
    return out.reshape(-1)[:n].reshape(orig_shape)


def _softmax_streaming(flat, n, orig_shape, orig_dtype, block_rows=_TARGET_ROWS):
    rows = pl.cdiv(n, _LANES)
    n128 = rows * _LANES
    if n128 != n:
        # Rare ragged case (n not a multiple of 128): minimal -inf pad so the
        # (rows, 128) reshape is possible; aligned sizes take the zero-copy path.
        flat = jnp.pad(flat, (0, n128 - n), constant_values=-jnp.inf)
    x2d = flat.reshape(rows, _LANES)

    bm = min(block_rows, _round_up(rows, _SUBLANES))
    nblk = pl.cdiv(rows, bm)
    ragged = (nblk * bm != rows)
    itemsize = jnp.dtype(orig_dtype).itemsize

    # Phase 0: per-block partial max / rescaled exp-sum (parallel grid).
    m_part, s_part = pl.pallas_call(
        functools.partial(_partials_kernel, bm=bm, rows=rows, ragged=ragged),
        out_shape=(jax.ShapeDtypeStruct((nblk, _SUBLANES, _LANES), jnp.float32),
                   jax.ShapeDtypeStruct((nblk, _SUBLANES, _LANES), jnp.float32)),
        grid=(nblk,),
        in_specs=[pl.BlockSpec((bm, _LANES), lambda t: (t, 0))],
        out_specs=(pl.BlockSpec((1, _SUBLANES, _LANES), lambda t: (t, 0, 0)),
                   pl.BlockSpec((1, _SUBLANES, _LANES), lambda t: (t, 0, 0))),
        compiler_params=pltpu.CompilerParams(
            dimension_semantics=("parallel",),
            vmem_limit_bytes=_VMEM_LIMIT),
        cost_estimate=pl.CostEstimate(
            flops=3 * n128, transcendentals=n128,
            bytes_accessed=n128 * itemsize + 2 * nblk * _SUBLANES * _LANES * 4),
    )(x2d)

    # Tiny XLA logsumexp-combine of the partials; fold (m, s) into one scalar.
    m = jnp.max(m_part)
    s = jnp.sum(s_part * jnp.exp(m_part - m))
    z = (m + jnp.log(s)).reshape(1, 1).astype(jnp.float32)

    # Phase 1: y = exp(x - z), streamed; OOB rows of the last block are dropped.
    out2d = pl.pallas_call(
        _normalize_kernel,
        out_shape=jax.ShapeDtypeStruct((rows, _LANES), orig_dtype),
        grid=(nblk,),
        in_specs=[pl.BlockSpec((1, 1), lambda t: (0, 0)),
                  pl.BlockSpec((bm, _LANES), lambda t: (t, 0))],
        out_specs=pl.BlockSpec((bm, _LANES), lambda t: (t, 0)),
        compiler_params=pltpu.CompilerParams(
            dimension_semantics=("parallel",),
            vmem_limit_bytes=_VMEM_LIMIT),
        cost_estimate=pl.CostEstimate(
            flops=n128, transcendentals=n128,
            bytes_accessed=2 * n128 * itemsize),
    )(z, x2d)

    return out2d.reshape(-1)[:n].reshape(orig_shape)


def softmax_stable(x: jax.Array) -> jax.Array:
    """Global numerically-stable softmax, matching SoftmaxStable.forward."""
    n = x.size
    flat = x.reshape(-1)
    if n <= _RESIDENT_MAX_ELEMS:
        return _softmax_resident(flat, n, x.shape, x.dtype)
    return _softmax_streaming(flat, n, x.shape, x.dtype)


def _reference(x):
    c = jnp.max(x)
    e = jnp.exp(x - c)
    return e / jnp.sum(e)


if __name__ == "__main__":
    key = jax.random.PRNGKey(0)

    # Small NCHW input consistent with the module (B=2, C=4, H=W=16).
    x = jax.random.normal(key, (2, 4, 16, 16), dtype=jnp.float32)
    y = softmax_stable(x)
    jax.block_until_ready(y)
    assert y.shape == x.shape and y.dtype == x.dtype
    assert jnp.allclose(y, _reference(x), atol=1e-6, rtol=1e-5)

    # Ragged size (not a multiple of 128) through the resident path.
    x_odd = jax.random.normal(jax.random.PRNGKey(1), (3, 5, 7), dtype=jnp.float32)
    y_odd = softmax_stable(x_odd)
    jax.block_until_ready(y_odd)
    assert jnp.allclose(y_odd, _reference(x_odd), atol=1e-6, rtol=1e-5)

    # Exercise the streaming two-phase path at small size with a tiny block:
    # multi-block + ragged tail masking + lane padding.
    x_s = jax.random.normal(jax.random.PRNGKey(2), (50, 50), dtype=jnp.float32)
    y_s = _softmax_streaming(x_s.reshape(-1), x_s.size, x_s.shape, x_s.dtype,
                             block_rows=8)
    jax.block_until_ready(y_s)
    assert jnp.allclose(y_s, _reference(x_s), atol=1e-6, rtol=1e-5)

    # Streaming path, lane-aligned (zero-copy reshape), multi-block, non-ragged.
    x_a = jax.random.normal(jax.random.PRNGKey(3), (8, 1024), dtype=jnp.float32)
    y_a = _softmax_streaming(x_a.reshape(-1), x_a.size, x_a.shape, x_a.dtype,
                             block_rows=16)
    jax.block_until_ready(y_a)
    assert jnp.allclose(y_a, _reference(x_a), atol=1e-6, rtol=1e-5)

    print("KERNEL_OK")
</pallas_src>

<mosaic_0001>
module attributes {stable_mosaic.version = 11 : i64} {
  func.func @_resident_kernel(%arg0: i32, %arg1: memref<16x128xf32, #tpu.memory_space<vmem>>, %arg2: memref<16x128xf32, #tpu.memory_space<vmem>>) attributes {dimension_semantics = [#tpu.dimension_semantics<arbitrary>], iteration_bounds = array<i64: 1>, scalar_prefetch = 0 : i64, scratch_operands = 0 : i64, tpu.core_type = #tpu.core_type<tc>, window_params = [{pipeline_mode = #tpu.pipeline_mode<synchronous>, transform_indices = @transform_0, window_bounds = array<i64: 16, 128>}, {pipeline_mode = #tpu.pipeline_mode<synchronous>, transform_indices = @transform_1, window_bounds = array<i64: 16, 128>}]} {
    %c0 = arith.constant 0 : index
    %c0_0 = arith.constant 0 : index
    %0 = vector.load %arg1[%c0, %c0_0] : memref<16x128xf32, #tpu.memory_space<vmem>>, vector<16x128xf32>
    %1 = vector.shape_cast %0 : vector<16x128xf32> to vector<1x16x128xf32>
    %cst = arith.constant dense<0xFF800000> : vector<1xf32>
    %2 = vector.multi_reduction <maximumf>, %1, %cst [1, 2] : vector<1x16x128xf32> to vector<1xf32>
    %3 = vector.shape_cast %2 : vector<1xf32> to vector<1x1x1xf32>
    %4 = vector.extract %3[0, 0, 0] : f32 from vector<1x1x1xf32>
    %5 = vector.broadcast %4 : f32 to vector<16x128xf32>
    %6 = arith.subf %0, %5 : vector<16x128xf32>
    %7 = math.exp %6 : vector<16x128xf32>
    %8 = vector.shape_cast %7 : vector<16x128xf32> to vector<1x16x128xf32>
    %cst_1 = arith.constant dense<0.000000e+00> : vector<1xf32>
    %9 = vector.multi_reduction <add>, %8, %cst_1 [1, 2] : vector<1x16x128xf32> to vector<1xf32>
    %10 = vector.shape_cast %9 : vector<1xf32> to vector<1x1x1xf32>
    %11 = vector.extract %10[0, 0, 0] : f32 from vector<1x1x1xf32>
    %cst_2 = arith.constant 1.000000e+00 : f32
    %12 = arith.divf %cst_2, %11 : f32
    %13 = vector.broadcast %12 : f32 to vector<16x128xf32>
    %14 = arith.mulf %7, %13 : vector<16x128xf32>
    %c0_3 = arith.constant 0 : index
    %c0_4 = arith.constant 0 : index
    %15 = vector.load %arg2[%c0_3, %c0_4] : memref<16x128xf32, #tpu.memory_space<vmem>>, vector<16x128xf32>
    tpu.vector_store %arg2[%c0_3, %c0_4], %14 {strides = array<i32>} : memref<16x128xf32, #tpu.memory_space<vmem>>, vector<16x128xf32>,
    return
  }
  func.func @transform_0(%arg0: i32) -> (i32, i32) {
    %c0_i32 = arith.constant 0 : i32
    %c0_i32_0 = arith.constant 0 : i32
    %c0_i32_1 = arith.constant 0 : i32
    return %c0_i32, %c0_i32_0 : i32, i32
  }
  func.func @transform_1(%arg0: i32) -> (i32, i32) {
    %c0_i32 = arith.constant 0 : i32
    %c0_i32_0 = arith.constant 0 : i32
    %c0_i32_1 = arith.constant 0 : i32
    return %c0_i32, %c0_i32_0 : i32, i32
  }
}

</mosaic_0001>

<bundles_post_ra>
// kernel: tpu_custom_call.1
= control target key start
LH: loop header
LB: loop body
LE: loop exit
PB: predicated region body
PF: predicated region fallthrough
CT: control target
= control target key end

     0   :  { %6 = vsyncpa [#allocation3], 0  ;;  %s185_s0 = inlined_call_operand.hbm [shape: f32[16,128], index: 0, kind: input, shape index: {}]   ;;  %s186_s1 = inlined_call_operand.hbm [shape: f32[16,128], index: 1, kind: output, shape index: {}]  }
   0x1   :  { %7 = vsyncpa [#allocation4], 0  ;;  %s141_s6 = smov [#allocation2]   ;;  %s93_s10 = scalar_lea.hbm %s185_s0, 256 }
   0x2   :  { %s13_s7 = sshll.u32 %s141_s6, 4  ;;  %p94_p0 = scmp.ne.s32.totalorder %s185_s0, %s93_s10  ;;  %s14_s7 = int_to_ptr.vmem [resolvable:$true] %s13_s7 }
   0x3   :  { %p97_p1 = scmp.lt.u32.totalorder %s93_s10, %s185_s0 }
   0x5   :  { %p99_p2 = pnand %p97_p1, %p94_p0 }
   0x7   :  { %102 = shalt.err (!%p99_p2)
}
   0x8   :  { %s103_s15 = scalar_lea.vmem %s14_s7, 256  ;;  %p108_p4 = scmp.lt.s32.totalorder %s14_s7, %s14_s7 }
   0x9   :  { %p104_p3 = scmp.ne.s32.totalorder %s14_s7, %s103_s15  ;;  %p109_p5 = scmp.lt.s32.totalorder %s103_s15, %s103_s15 }
   0xb   :  { %p110_p6 = por %p109_p5, %p108_p4 }
   0xd   :  { %p111_p7 = pnand %p110_p6, %p104_p3 }
   0xf   :  { %114 = shalt.err (!%p111_p7)
}
  0x10   :  { %s142_s16 = smov 128   ;;  %s143_s17 = smov 8  }
  0x11   :  { %19 = dma.hbm_to_vmem [thread:$0]  %s185_s0, 256, %s14_s7, [#allocation3], %s142_s16, %s142_s16, %s143_s17  }
  0x12   :  { %137 = dma.done.wait [#allocation3], 256  }
  0x13   :  { %138 = vsyncadd [#allocation3], 4294967040  ;;  %v23_v0 = vld [vmem:[#allocation2] sm:$0xff]  ;;  %v24_v1 = vld [vmem:[#allocation2 + $0x8] sm:$0xff]  ;;  %s144_s21 = smov [#allocation5]  }
  0x14   :  { %v25_v2 = vmax.f32 %v23_v0, %v24_v1  ;;  %s65_s22 = sshll.u32 %s144_s21, 4  ;;  %s66_s22 = int_to_ptr.vmem [resolvable:$true] %s65_s22 }
  0x15   :  { %s115_s24 = scalar_lea.vmem %s66_s22, 256  ;;  %p120_p9 = scmp.lt.s32.totalorder %s66_s22, %s66_s22 }
  0x16   :  { %26 = vmax.xlane.f32.xlu0 %v25_v2  ;;  %p116_p8 = scmp.ne.s32.totalorder %s66_s22, %s115_s24  ;;  %p121_p10 = scmp.lt.s32.totalorder %s115_s24, %s115_s24 }
  0x18   :  { %p122_p11 = por %p121_p10, %p120_p9 }
  0x1a   :  { %p123_p12 = pnand %p122_p11, %p116_p8 }
  0xa3   :  { %v27_v3 = vpop.xlane.xlu0 %26 }
  0xa4   :  { %v28_v4 = vrot.slane %v27_v3, 4 }
  0xa6   :  { %v29_v5 = vmax.f32 %v27_v3, %v28_v4 }
  0xa8   :  { %v30_v6 = vrot.slane %v29_v5, 2 }
  0xaa   :  { %v31_v7 = vmax.f32 %v29_v5, %v30_v6 }
  0xac   :  { %v32_v8 = vrot.slane %v31_v7, 1 }
  0xae   :  { %v33_v9 = vmax.f32 %v31_v7, %v32_v8 }
  0xb0   :  { %77 = vpush %v33_v9 }
  0xe1   :  { %s78_s20 = spop %77 }
  0xe2   :  { %v35_v10 = vstv %s78_s20 }
  0xe3   :  { %v36_v11 = vsub.f32 %v23_v0, %v35_v10  ;;  %v37_v12 = vsub.f32 %v24_v1, %v35_v10 }
  0xe5   :  { %v38_v13 = vmul.f32 1.442695, %v36_v11  ;;  %v40_v14 = vmul.f32 1.442695, %v37_v12 }
  0xe7   :  { %87 = vpow2.f32 %v38_v13 }
  0xe8   :  { %89 = vpow2.f32 %v40_v14 }
  0xf1   :  { %v88_v15 = vpop.eup %87 }
  0xf2   :  { %v90_v16 = vpop.eup %89 }
  0xf3   :  { %v42_v17 = vadd.f32 %v90_v16, %v88_v15 }
  0xf5   :  { %43 = vadd.xlane.f32.xlu0 %v42_v17 }
 0x182   :  { %v44_v18 = vpop.xlane.xlu0 %43 }
 0x183   :  { %v45_v19 = vrot.slane %v44_v18, 4 }
 0x185   :  { %v46_v20 = vadd.f32 %v45_v19, %v44_v18 }
 0x187   :  { %v47_v21 = vrot.slane %v46_v20, 2 }
 0x189   :  { %v48_v22 = vadd.f32 %v47_v21, %v46_v20 }
 0x18b   :  { %v49_v23 = vrot.slane %v48_v22, 1 }
 0x18d   :  { %v50_v24 = vadd.f32 %v49_v23, %v48_v22 }
 0x18f   :  { %79 = vpush %v50_v24 }
 0x1c0   :  { %s80_s0 = spop %79 }
 0x1c1   :  { %v52_v25 = vstv %s80_s0 }
 0x1c2   :  { %91 = vrcp.f32 %v52_v25 }
 0x1cc   :  { %v92_v26 = vpop.eup %91 }
 0x1cd   :  { %81 = vpush %v92_v26 }
 0x1fe   :  { %s82_s23 = spop %81 }
 0x1ff   :  { %v55_v27 = vstv %s82_s23 }
 0x200   :  { %v56_v28 = vmul.f32 %v88_v15, %v55_v27  ;;  %v57_v29 = vmul.f32 %v90_v16, %v55_v27 }
 0x202   :  { %58 = vst [vmem:[#allocation5] sm:$0xff] %v56_v28  ;;  %59 = vst [vmem:[#allocation5 + $0x8] sm:$0xff] %v57_v29 }
 0x203   :  { %126 = shalt.err (!%p123_p12)
}
 0x204   :  { %s127_s27 = scalar_lea.hbm %s186_s1, 256 }
 0x205   :  { %p128_p13 = scmp.ne.s32.totalorder %s186_s1, %s127_s27  ;;  %p131_p0 = scmp.lt.u32.totalorder %s127_s27, %s186_s1 }
 0x207   :  { %p133_p1 = pnand %p131_p0, %p128_p13 }
 0x209   :  { %136 = shalt.err (!%p133_p1)
}
 0x20a   :  { %71 = dma.vmem_to_hbm [thread:$0]  %s66_s22, 256, %s186_s1, [#allocation4], %s142_s16, %s142_s16, %s143_s17  }
 0x20b   :  { %139 = dma.done.wait [#allocation4], 256  }
 0x20c   :  { %140 = vsyncadd [#allocation4], 4294967040 }
 0x20d   :  { %75 = vsyncpa [#allocation3], 1 }
 0x20e   :  { %76 = vsyncpa [#allocation4], 1 }

</bundles_post_ra>
